<compile_context>
chip_gen: v7x
topology: tpu7x:2x2x1
jax: 0.10.0
libtpu: 0.0.40
codegen_flags: <defaults>
</compile_context>

<pallas_src>
import functools

import numpy as np

import jax
import jax.numpy as jnp
from jax.experimental import pallas as pl
from jax.experimental.pallas import tpu as pltpu


def _tv_kernel(x_ref, o_ref, *, num_channels, ch_height, num_rows, padded):
    """One (block_rows, W) row-block of the flattened (C*H, W) patch.

    x_ref : (block_rows, W) VMEM  current row block (native dtype)
    o_ref : (1, 8, 128)     VMEM  this block's partial sum (broadcast scalar)
    """
    i = pl.program_id(0)
    x = x_ref[...].astype(jnp.float32)        # f32 math regardless of input dtype
    t_h, _ = x.shape
    eps = jnp.float32(1e-6)

    row_in_blk = jax.lax.broadcasted_iota(jnp.int32, x.shape, 0)
    col = jax.lax.broadcasted_iota(jnp.int32, x.shape, 1)
    row_global = row_in_blk + i * t_h

    # ---- W direction: |x[r, j] - x[r, j-1] + eps|, valid for j >= 1 --------
    d_w = jnp.abs(x - pltpu.roll(x, shift=1, axis=1) + eps)   # lane rotate (XLU)
    valid_w = col >= 1
    if padded:                                                # trace-time flag
        valid_w = valid_w & (row_global < num_rows)
    contrib = jnp.where(valid_w, d_w, 0.0)

    # ---- H direction: |x[r, :] - x[r-1, :] + eps| -----------------------------
    # Valid iff the previous row lives in this block AND belongs to the same
    # channel.  Block-boundary diffs (row_in_blk == 0) are added in the wrapper.
    d_h = jnp.abs(x - pltpu.roll(x, shift=1, axis=0) + eps)   # sublane rotate (XLU)
    valid_h = row_in_blk >= 1
    for c in range(1, num_channels):          # exclude channel-first rows; C is a
        valid_h = valid_h & (row_global != c * ch_height)     # trace-time constant
    if padded:
        valid_h = valid_h & (row_global < num_rows)
    contrib = contrib + jnp.where(valid_h, d_h, 0.0)

    # One tile-local reduce per block; broadcast to a full vreg so the
    # write-back is a plain lane-dense store.
    partial = jnp.sum(contrib)
    o_ref[...] = jnp.full(o_ref.shape, partial, dtype=o_ref.dtype)


def total_variation(adv_patch: jax.Array, *, block_rows: int | None = None) -> jax.Array:
    """(sum |dW + 1e-6| + sum |dH + 1e-6|) / numel for a (C, H, W) patch."""
    assert adv_patch.ndim == 3, "expected (C, H, W) patch"
    C, H, W = adv_patch.shape
    R = C * H
    numel = C * H * W

    # Lane-dense 2-D view: W on lanes, all (channel, row) pairs on sublanes.
    x2d = adv_patch.reshape(R, W)

    # Row-tile: whole array if small, else the largest multiple-of-8 row count
    # keeping one f32 tile at ~4 MiB (input double-buffer + f32 temporaries fit
    # comfortably under the 48 MiB scoped VMEM limit on v5e/v6e/v7x).
    # TODO(synk): very wide W with tiny H would need lane tiling as well.
    if block_rows is None:
        budget_bytes = 4 * 1024 * 1024
        block_rows = max(8, budget_bytes // max(W * 4, 1))
    block_rows = min(int(block_rows), R)
    if block_rows < R:
        block_rows = max(8, (block_rows // 8) * 8)
    grid = pl.cdiv(R, block_rows)
    r_pad = grid * block_rows
    padded = r_pad != R
    x_in = jnp.pad(x2d, ((0, r_pad - R), (0, 0))) if padded else x2d

    kernel = functools.partial(
        _tv_kernel, num_channels=C, ch_height=H, num_rows=R, padded=padded)

    partials = pl.pallas_call(
        kernel,
        grid=(grid,),
        in_specs=[pl.BlockSpec((block_rows, W), lambda i: (i, 0))],
        out_specs=pl.BlockSpec((1, 8, 128), lambda i: (i, 0, 0)),
        out_shape=jax.ShapeDtypeStruct((grid, 8, 128), jnp.float32),
        compiler_params=pltpu.CompilerParams(
            # stateless per-block partials -> safe to shard across TensorCores
            dimension_semantics=("parallel",),
            vmem_limit_bytes=48 * 1024 * 1024,
        ),
    )(x_in)

    total = jnp.sum(partials[:, 0, 0])

    # H-direction diffs that straddle a block boundary were skipped in-kernel;
    # add them here (static selection, at most grid-1 rows of width W).
    if grid > 1:
        b_rows = np.arange(1, grid, dtype=np.int64) * block_rows
        b_rows = b_rows[(b_rows < R) & (b_rows % H != 0)]
        if b_rows.size:
            cur = x2d[b_rows].astype(jnp.float32)
            prev = x2d[b_rows - 1].astype(jnp.float32)
            total = total + jnp.sum(jnp.abs(cur - prev + jnp.float32(1e-6)))

    return total / numel


def _reference_tv(adv_patch: jax.Array) -> jax.Array:
    x = adv_patch.astype(jnp.float32)
    tv1 = jnp.sum(jnp.abs(x[:, :, 1:] - x[:, :, :-1] + 1e-6))
    tv2 = jnp.sum(jnp.abs(x[:, 1:, :] - x[:, :-1, :] + 1e-6))
    return (tv1 + tv2) / x.size


if __name__ == "__main__":
    key = jax.random.PRNGKey(0)
    k1, k2 = jax.random.split(key)

    # 1) typical small adversarial patch -> single-block path
    patch_small = jax.random.uniform(k1, (3, 16, 16), dtype=jnp.float32)
    tv_small = jax.block_until_ready(total_variation(patch_small))
    ref_small = jax.block_until_ready(_reference_tv(patch_small))
    assert jnp.allclose(tv_small, ref_small, rtol=2e-5, atol=1e-6), (tv_small, ref_small)

    # 2) larger patch with a forced small row-tile -> exercises the gridded
    #    parallel path, the padded final block, and the boundary-row fixup
    patch_big = jax.random.uniform(k2, (3, 40, 128), dtype=jnp.float32)
    tv_big = jax.block_until_ready(total_variation(patch_big, block_rows=16))
    ref_big = jax.block_until_ready(_reference_tv(patch_big))
    assert jnp.allclose(tv_big, ref_big, rtol=2e-5, atol=1e-6), (tv_big, ref_big)

    print("KERNEL_OK")
</pallas_src>

<mosaic_0001>
module attributes {stable_mosaic.version = 11 : i64} {
  func.func @_tv_kernel(%arg0: i32, %arg1: memref<48x16xf32, #tpu.memory_space<vmem>>, %arg2: memref<1x8x128xf32, #tpu.memory_space<vmem>>) attributes {dimension_semantics = [#tpu.dimension_semantics<parallel>], iteration_bounds = array<i64: 1>, scalar_prefetch = 0 : i64, scratch_operands = 0 : i64, tpu.core_type = #tpu.core_type<tc>, window_params = [{transform_indices = @transform_0, window_bounds = array<i64: 48, 16>}, {transform_indices = @transform_1, window_bounds = array<i64: 1, 8, 128>}]} {
    %c0 = arith.constant 0 : index
    %c0_0 = arith.constant 0 : index
    %0 = vector.load %arg1[%c0, %c0_0] : memref<48x16xf32, #tpu.memory_space<vmem>>, vector<48x16xf32>
    %1 = tpu.iota {dimensions = array<i32: 0>} : vector<48x16xi32>
    %2 = tpu.iota {dimensions = array<i32: 1>} : vector<48x16xi32>
    %c48_i32 = arith.constant 48 : i32
    %3 = arith.muli %arg0, %c48_i32 : i32
    %4 = vector.broadcast %3 : i32 to vector<48x16xi32>
    %5 = arith.addi %1, %4 : vector<48x16xi32>
    %c1_i32 = arith.constant 1 : i32
    %6 = tpu.dynamic_rotate %0 by %c1_i32 dim 1 : vector<48x16xf32>, i32 -> vector<48x16xf32>
    %7 = arith.subf %0, %6 : vector<48x16xf32>
    %cst = arith.constant 9.99999997E-7 : f32
    %8 = vector.broadcast %cst : f32 to vector<48x16xf32>
    %9 = arith.addf %7, %8 : vector<48x16xf32>
    %10 = math.absf %9 : vector<48x16xf32>
    %c1_i32_1 = arith.constant 1 : i32
    %11 = vector.broadcast %c1_i32_1 : i32 to vector<48x16xi32>
    %12 = arith.cmpi sge, %2, %11 : vector<48x16xi32>
    %cst_2 = arith.constant 0.000000e+00 : f32
    %13 = vector.broadcast %cst_2 : f32 to vector<48x16xf32>
    %14 = arith.select %12, %10, %13 : vector<48x16xi1>, vector<48x16xf32>
    %c1_i32_3 = arith.constant 1 : i32
    %15 = tpu.dynamic_rotate %0 by %c1_i32_3 dim 0 : vector<48x16xf32>, i32 -> vector<48x16xf32>
    %16 = arith.subf %0, %15 : vector<48x16xf32>
    %cst_4 = arith.constant 9.99999997E-7 : f32
    %17 = vector.broadcast %cst_4 : f32 to vector<48x16xf32>
    %18 = arith.addf %16, %17 : vector<48x16xf32>
    %19 = math.absf %18 : vector<48x16xf32>
    %c1_i32_5 = arith.constant 1 : i32
    %20 = vector.broadcast %c1_i32_5 : i32 to vector<48x16xi32>
    %21 = arith.cmpi sge, %1, %20 : vector<48x16xi32>
    %c16_i32 = arith.constant 16 : i32
    %22 = vector.broadcast %c16_i32 : i32 to vector<48x16xi32>
    %23 = arith.cmpi ne, %5, %22 : vector<48x16xi32>
    %24 = arith.andi %21, %23 : vector<48x16xi1>
    %c32_i32 = arith.constant 32 : i32
    %25 = vector.broadcast %c32_i32 : i32 to vector<48x16xi32>
    %26 = arith.cmpi ne, %5, %25 : vector<48x16xi32>
    %27 = arith.andi %24, %26 : vector<48x16xi1>
    %cst_6 = arith.constant 0.000000e+00 : f32
    %28 = vector.broadcast %cst_6 : f32 to vector<48x16xf32>
    %29 = arith.select %27, %19, %28 : vector<48x16xi1>, vector<48x16xf32>
    %30 = arith.addf %14, %29 : vector<48x16xf32>
    %31 = vector.shape_cast %30 : vector<48x16xf32> to vector<1x48x16xf32>
    %cst_7 = arith.constant dense<0.000000e+00> : vector<1xf32>
    %32 = vector.multi_reduction <add>, %31, %cst_7 [1, 2] : vector<1x48x16xf32> to vector<1xf32>
    %33 = vector.shape_cast %32 : vector<1xf32> to vector<1x1x1xf32>
    %34 = vector.extract %33[0, 0, 0] : f32 from vector<1x1x1xf32>
    %35 = vector.broadcast %34 : f32 to vector<1x8x128xf32>
    %c0_8 = arith.constant 0 : index
    %c0_9 = arith.constant 0 : index
    %c0_10 = arith.constant 0 : index
    %36 = vector.load %arg2[%c0_8, %c0_9, %c0_10] : memref<1x8x128xf32, #tpu.memory_space<vmem>>, vector<1x8x128xf32>
    tpu.vector_store %arg2[%c0_8, %c0_9, %c0_10], %35 {strides = array<i32>} : memref<1x8x128xf32, #tpu.memory_space<vmem>>, vector<1x8x128xf32>,
    return
  }
  func.func @transform_0(%arg0: i32) -> (i32, i32) {
    %c0_i32 = arith.constant 0 : i32
    %c0_i32_0 = arith.constant 0 : i32
    return %arg0, %c0_i32 : i32, i32
  }
  func.func @transform_1(%arg0: i32) -> (i32, i32, i32) {
    %c0_i32 = arith.constant 0 : i32
    %c0_i32_0 = arith.constant 0 : i32
    %c0_i32_1 = arith.constant 0 : i32
    return %arg0, %c0_i32, %c0_i32_0 : i32, i32, i32
  }
}

</mosaic_0001>

<bundles_post_ra>
// kernel: tpu_custom_call.1
= control target key start
LH: loop header
LB: loop body
LE: loop exit
PB: predicated region body
PF: predicated region fallthrough
CT: control target
= control target key end

     0   :  { %s257_s10 = smov 16   ;;  %s388_s0 = inlined_call_operand.vmem [shape: f32[48,16], index: 0, kind: input, shape index: {}]   ;;  %s389_s1 = inlined_call_operand.hbm [shape: f32[1,8,128], index: 1, kind: output, shape index: {}]  }
   0x1   :  { %v273_v0 = vld [vmem:[%s388_s0] sm:$0xff]  ;;  %v278_v1 = vld [vmem:[%s388_s0 + $0x10] sm:$0xff]  ;;  %v285_v2 = vld [vmem:[%s388_s0 + $0x8] sm:$0xff] }
   0x2   :  { %33 = vrot.lane.b32.xlu0 %v273_v0, %s257_s10  ;;  %39 = vrot.lane.b32.xlu1 %v278_v1, %s257_s10  ;;  %v290_v3 = vld [vmem:[%s388_s0 + $0x18] sm:$0xff] }
   0x3   :  { %6 = vsyncpa [#allocation3], 0  ;;  %v297_v4 = vld [vmem:[%s388_s0 + $0x20] sm:$0xff]  ;;  %v302_v5 = vld [vmem:[%s388_s0 + $0x28] sm:$0xff]  ;;  %vm32_vm0 = vcmask 1047680   ;;  %s258_s0 = smov 113   ;;  %v15_v30 = vlaneseq }
   0x4   :  { %v123_v32 = vrot.slane %v302_v5, 7  ;;  %v118_v33 = vrot.slane %v273_v0, 7  ;;  %v119_v34 = vrot.slane %v285_v2, 7  ;;  %v120_v35 = vrot.slane %v278_v1, 7  ;;  %s259_s19 = smov [#allocation2]  }
   0x5   :  { %v16_v31 = vshrl.u32 %v15_v30, 7  ;;  %v121_v38 = vrot.slane %v290_v3, 7  ;;  %v122_v39 = vrot.slane %v297_v4, 7  ;;  %v343_v45 = vand.u32 127, %v15_v30  ;;  %s220_s20 = sshll.u32 %s259_s19, 4  ;;  %s221_s20 = int_to_ptr.vmem [resolvable:$true] %s220_s20 }
   0x6   :  { %36 = vrot.lane.b32.xlu0 %v285_v2, %s257_s10  ;;  %42 = vrot.lane.b32.xlu1 %v290_v3, %s257_s10  ;;  %vm191_vm5 = vcmask 130048   ;;  %s233_s22 = scalar_lea.vmem %s221_s20, 128  ;;  %p238_p1 = scmp.lt.s32.totalorder %s221_s20, %s221_s20 }
   0x7   :  { %vm124_vm1 = vcmp.lt.s32.totalorder %v16_v31, 1  ;;  %v18_v48 = vadd.s32 16, %v16_v31  ;;  %vm111_vm2 = vcmp.ge.s32.totalorder %v343_v45, 1  ;;  %vm149_vm3 = vcmp.ge.s32.totalorder %v16_v31, 1  ;;  %p234_p0 = scmp.ne.s32.totalorder %s221_s20, %s233_s22  ;;  %p239_p2 = scmp.lt.s32.totalorder %s233_s22, %s233_s22 }
   0x8   :  { %v130_v36 = vsel %vm124_vm1, %v123_v32, %v118_v33  ;;  %v128_v37 = vsel %vm124_vm1, %v119_v34, %v120_v35  ;;  %v129_v41 = vsel %vm124_vm1, %v118_v33, %v119_v34  ;;  %v126_v43 = vsel %vm124_vm1, %v121_v38, %v122_v39 }
   0x9   :  { %v131_v40 = vsub.f32 %v273_v0, %v130_v36  ;;  %v133_v42 = vsub.f32 %v278_v1, %v128_v37  ;;  %v132_v44 = vsub.f32 %v285_v2, %v129_v41  ;;  %v135_v50 = vsub.f32 %v297_v4, %v126_v43  ;;  %p240_p3 = por %p239_p2, %p238_p1 }
   0xa   :  { %45 = vrot.lane.b32.xlu0 %v297_v4, %s257_s10  ;;  %48 = vrot.lane.b32.xlu1 %v302_v5, %s257_s10  ;;  %v127_v52 = vsel %vm124_vm1, %v120_v35, %v121_v38  ;;  %vm157_vm4 = vcmp.ne.s32.totalorder %v18_v48, 16 }
   0xb   :  { %v137_v46 = vadd.f32 1e-06, %v131_v40  ;;  %v139_v49 = vadd.f32 1e-06, %v133_v42  ;;  %v138_v53 = vadd.f32 1e-06, %v132_v44  ;;  %v134_v59 = vsub.f32 %v290_v3, %v127_v52  ;;  %p241_p4 = pnand %p240_p3, %p234_p0 }
   0xc   :  { %v141_v60 = vadd.f32 1e-06, %v135_v50 }
   0xd   :  { %v143_v55 = vand.u32 2147483647, %v137_v46  ;;  %v145_v57 = vand.u32 2147483647, %v139_v49 }
  0x74   :  { %v34_v6 = vpop.permute.xlu0 %33  ;;  %v40_v7 = vpop.permute.xlu1 %39 }
  0x75   :  { %v35_v8 = vsel %vm32_vm0, %v34_v6, %v273_v0  ;;  %v41_v9 = vsel %vm32_vm0, %v40_v7, %v278_v1  ;;  %v144_v6 = vand.u32 2147483647, %v138_v53  ;;  %v20_v7 = vadd.s32 32, %v16_v31 }
  0x76   :  { %51 = vrot.lane.b32.xlu0 %v35_v8, %s257_s10 }
  0x77   :  { %vm171_vm6 = vcmp.ne.s32.totalorder %v20_v7, 32 }
  0x78   :  { %v37_v10 = vpop.permute.xlu0 %36  ;;  %v43_v11 = vpop.permute.xlu1 %42 }
  0x79   :  { %v38_v12 = vsel %vm32_vm0, %v37_v10, %v285_v2  ;;  %v44_v13 = vsel %vm32_vm0, %v43_v11, %v290_v3 }
  0x7a   :  { %55 = vrot.lane.b32.xlu0 %v41_v9, %s257_s10  ;;  %53 = vrot.lane.b32.xlu1 %v38_v12, %s257_s10  ;;  %v179_v9 = vsel %vm149_vm3, %v143_v55, 0.0  ;;  %v181_v12 = vsel %vm157_vm4, %v145_v57, 0.0 }
  0x7c   :  { %v46_v14 = vpop.permute.xlu0 %45  ;;  %v49_v15 = vpop.permute.xlu1 %48 }
  0x7d   :  { %v47_v16 = vsel %vm32_vm0, %v46_v14, %v297_v4  ;;  %v50_v17 = vsel %vm32_vm0, %v49_v15, %v302_v5  ;;  %v147_v15 = vand.u32 2147483647, %v141_v60 }
  0x7e   :  { %57 = vrot.lane.b32.xlu1 %v44_v13, %s257_s10  ;;  %59 = vrot.lane.b32.xlu0 %v47_v16, %s257_s10  ;;  %v140_v13 = vadd.f32 1e-06, %v134_v59 }
  0x82   :  { %61 = vrot.lane.b32.xlu1 %v50_v17, %s257_s10 }
  0xe8   :  { %v52_v18 = vpop.permute.xlu0 %51 }
  0xe9   :  { %v63_v19 = vsel %vm32_vm0, %v52_v18, %v273_v0 }
  0xea   :  { %75 = vrot.lane.b32.xlu0 %v63_v19, %s258_s0 }
  0xec   :  { %v54_v20 = vpop.permute.xlu1 %53  ;;  %v56_v21 = vpop.permute.xlu0 %55 }
  0xed   :  { %v64_v22 = vsel %vm32_vm0, %v54_v20, %v285_v2  ;;  %v65_v23 = vsel %vm32_vm0, %v56_v21, %v278_v1 }
  0xee   :  { %77 = vrot.lane.b32.xlu1 %v64_v22, %s258_s0  ;;  %79 = vrot.lane.b32.xlu0 %v65_v23, %s258_s0 }
  0xf0   :  { %v58_v24 = vpop.permute.xlu1 %57  ;;  %v60_v25 = vpop.permute.xlu0 %59 }
  0xf1   :  { %v66_v26 = vsel %vm32_vm0, %v58_v24, %v290_v3  ;;  %v67_v27 = vsel %vm32_vm0, %v60_v25, %v297_v4 }
  0xf2   :  { %81 = vrot.lane.b32.xlu1 %v66_v26, %s258_s0  ;;  %83 = vrot.lane.b32.xlu0 %v67_v27, %s258_s0  ;;  %v146_v27 = vand.u32 2147483647, %v140_v13 }
  0xf4   :  { %v62_v28 = vpop.permute.xlu1 %61 }
  0xf5   :  { %v68_v29 = vsel %vm32_vm0, %v62_v28, %v302_v5 }
  0xf6   :  { %85 = vrot.lane.b32.xlu1 %v68_v29, %s258_s0 }
 0x15c   :  { %v76_v47 = vpop.permute.xlu0 %75 }
 0x15d   :  { %v93_v51 = vsub.f32 %v273_v0, %v76_v47  ;;  %v125_v0 = vsel %vm124_vm1, %v122_v39, %v123_v32 }
 0x15f   :  { %v99_v54 = vadd.f32 1e-06, %v93_v51 }
 0x160   :  { %v78_v56 = vpop.permute.xlu1 %77  ;;  %v80_v58 = vpop.permute.xlu0 %79 }
 0x161   :  { %v105_v61 = vand.u32 2147483647, %v99_v54  ;;  %v94_v62 = vsub.f32 %v285_v2, %v78_v56  ;;  %v95_v63 = vsub.f32 %v278_v1, %v80_v58  ;;  %v136_v2 = vsub.f32 %v302_v5, %v125_v0 }
 0x163   :  { %v112_v8 = vsel %vm111_vm2, %v105_v61, 0.0  ;;  %v100_v10 = vadd.f32 1e-06, %v94_v62  ;;  %v101_v11 = vadd.f32 1e-06, %v95_v63 }
 0x164   :  { %v82_v14 = vpop.permute.xlu1 %81  ;;  %v84_v16 = vpop.permute.xlu0 %83  ;;  %v185_v20 = vadd.f32 %v179_v9, %v112_v8  ;;  %v142_v29 = vadd.f32 1e-06, %v136_v2 }
 0x165   :  { %v106_v17 = vand.u32 2147483647, %v100_v10  ;;  %v107_v1 = vand.u32 2147483647, %v101_v11  ;;  %v96_v18 = vsub.f32 %v290_v3, %v82_v14  ;;  %v97_v19 = vsub.f32 %v297_v4, %v84_v16 }
 0x166   :  { %v183_v3 = vsel %vm171_vm6, %v147_v15, 0.0  ;;  %v192_v32 = vsel %vm191_vm5, %v185_v20, 0.0  ;;  %v148_v41 = vand.u32 2147483647, %v142_v29 }
 0x167   :  { %v113_v21 = vsel %vm111_vm2, %v106_v17, 0.0  ;;  %v114_v22 = vsel %vm111_vm2, %v107_v1, 0.0  ;;  %v102_v23 = vadd.f32 1e-06, %v96_v18  ;;  %v103_v24 = vadd.f32 1e-06, %v97_v19 }
 0x168   :  { %v186_v25 = vadd.f32 %v144_v6, %v113_v21  ;;  %v187_v26 = vadd.f32 %v181_v12, %v114_v22  ;;  %v86_v28 = vpop.permute.xlu1 %85 }
 0x169   :  { %v108_v30 = vand.u32 2147483647, %v102_v23  ;;  %v109_v31 = vand.u32 2147483647, %v103_v24  ;;  %v98_v4 = vsub.f32 %v302_v5, %v86_v28 }
 0x16a   :  { %v193_v33 = vsel %vm191_vm5, %v186_v25, 0.0  ;;  %v195_v38 = vsel %vm191_vm5, %v187_v26, 0.0 }
 0x16b   :  { %v194_v34 = vadd.f32 %v193_v33, %v192_v32  ;;  %v115_v35 = vsel %vm111_vm2, %v108_v30, 0.0  ;;  %v116_v36 = vsel %vm111_vm2, %v109_v31, 0.0  ;;  %v104_v37 = vadd.f32 1e-06, %v98_v4 }
 0x16c   :  { %v188_v39 = vadd.f32 %v146_v27, %v115_v35  ;;  %v189_v40 = vadd.f32 %v183_v3, %v116_v36 }
 0x16d   :  { %v110_v42 = vand.u32 2147483647, %v104_v37  ;;  %v196_v43 = vadd.f32 %v195_v38, %v194_v34 }
 0x16e   :  { %v197_v5 = vsel %vm191_vm5, %v188_v39, 0.0  ;;  %v199_v44 = vsel %vm191_vm5, %v189_v40, 0.0 }
 0x16f   :  { %v117_v46 = vsel %vm111_vm2, %v110_v42, 0.0  ;;  %v198_v47 = vadd.f32 %v197_v5, %v196_v43 }
 0x170   :  { %v190_v48 = vadd.f32 %v148_v41, %v117_v46 }
 0x171   :  { %v200_v49 = vadd.f32 %v199_v44, %v198_v47 }
 0x172   :  { %v201_v50 = vsel %vm191_vm5, %v190_v48, 0.0 }
 0x173   :  { %v202_v51 = vadd.f32 %v201_v50, %v200_v49 }
 0x175   :  { %203 = vadd.xlane.f32.xlu0 %v202_v51 }
 0x202   :  { %v204_v52 = vpop.xlane.xlu0 %203 }
 0x203   :  { %v205_v53 = vrot.slane %v204_v52, 4 }
 0x205   :  { %v206_v54 = vadd.f32 %v205_v53, %v204_v52 }
 0x207   :  { %v207_v55 = vrot.slane %v206_v54, 2 }
 0x209   :  { %v208_v56 = vadd.f32 %v207_v55, %v206_v54 }
 0x20b   :  { %v209_v57 = vrot.slane %v208_v56, 1 }
 0x20d   :  { %v210_v58 = vadd.f32 %v209_v57, %v208_v56 }
 0x20f   :  { %228 = vpush %v210_v58 }
 0x240   :  { %s229_s21 = spop %228 }
 0x241   :  { %v212_v45 = vstv %s229_s21 }
 0x242   :  { %213 = vst [vmem:[#allocation2] sm:$0xff] %v212_v45 }
 0x243   :  { %244 = shalt.err (!%p241_p4)
}
 0x244   :  { %s245_s25 = scalar_lea.hbm %s389_s1, 128 }
 0x245   :  { %p246_p5 = scmp.ne.s32.totalorder %s389_s1, %s245_s25  ;;  %p249_p6 = scmp.lt.u32.totalorder %s245_s25, %s389_s1 }
 0x247   :  { %p251_p7 = pnand %p249_p6, %p246_p5 }
 0x249   :  { %254 = shalt.err (!%p251_p7)
}
 0x24a   :  { %223 = dma.vmem_to_hbm [thread:$0]  %s221_s20, 128, %s389_s1, [#allocation3]  }
 0x24b   :  { %255 = dma.done.wait [#allocation3], 128  }
 0x24c   :  { %256 = vsyncadd [#allocation3], 4294967168 }
 0x24d   :  { %227 = vsyncpa [#allocation3], 1 }

</bundles_post_ra>
